<compile_context>
chip_gen: v7x
topology: tpu7x:2x2x1
jax: 0.10.0
libtpu: 0.0.40
codegen_flags: <defaults>
</compile_context>

<pallas_src>
from itertools import permutations

import numpy as np
import jax
import jax.numpy as jnp
from jax.experimental import pallas as pl
from jax.experimental.pallas import tpu as pltpu


def _round_up(x, m):
    return ((x + m - 1) // m) * m


def _make_pairwise_kernel(n_sources, tile_t, k_per_split, needs_mask,
                          cross_precision):
    """Accumulates the un-normalized pairwise MSE matrix over time tiles.

    o[0, 0, i, j] += sum_t (p[j, t] - g[i, t])^2
                   = sum_t g[i,t]^2 + sum_t p[j,t]^2 - 2 * sum_t g[i,t]*p[j,t]

    p_ref / g_ref are lane-dense [1, S, tile_t] blocks (time on lanes), so the
    cross term is one MXU contraction over the lane axis per tile.
    """

    def kernel(t_sm, p_ref, g_ref, o_ref):
        k = pl.program_id(2)

        @pl.when(k == 0)
        def _init():
            o_ref[...] = jnp.zeros_like(o_ref)

        p = p_ref[0]                      # [S, tile_t]
        g = g_ref[0]                      # [S, tile_t]

        if needs_mask:
            # Zero lanes past the true flattened length T (read from SMEM).
            # This also neutralizes wrapped/overhanging tail steps, whose
            # global offset t0 is >= T so every lane is masked.
            t0 = (pl.program_id(1) * k_per_split + k) * tile_t
            lane = jax.lax.broadcasted_iota(jnp.int32, (n_sources, tile_t), 1)
            valid = (lane + t0) < t_sm[0]
            p = jnp.where(valid, p, jnp.zeros_like(p))
            g = jnp.where(valid, g, jnp.zeros_like(g))

        # Cross term on the MXU: cross[i, j] = sum_t g[i, t] * p[j, t].
        # bf16 inputs are consumed natively; accumulation is f32.
        cross = jax.lax.dot_general(
            g, p,
            dimension_numbers=(((1,), (1,)), ((), ())),
            preferred_element_type=jnp.float32,
            precision=cross_precision)                     # [S, S]

        # Square terms on the VPU (upcast so v5e's f32-only VALU is happy).
        pf = p.astype(jnp.float32)
        gf = g.astype(jnp.float32)
        sp2 = jnp.sum(pf * pf, axis=1, keepdims=True)      # [S, 1]  (pred j)
        sg2 = jnp.sum(gf * gf, axis=1, keepdims=True)      # [S, 1]  (target i)

        mat = sg2 + sp2.T - 2.0 * cross                    # [S, S], mat[i, j]
        o_ref[...] += mat[None, None, :, :]

    return kernel


def pairwise_mse_matrix(preds, targets, *, tile_t=None, time_splits=None,
                        cross_precision=None):
    """loss_mat[b, i, j] = mean over all non-batch/non-source elements of
    (preds[b, ..., j] - targets[b, ..., i])**2, for inputs [B, ..., S]."""
    assert preds.shape == targets.shape, "preds/targets must have equal shape"
    B = preds.shape[0]
    S = preds.shape[-1]

    # Lane-dense layout: [B, S, T] so the flattened time axis sits on lanes.
    p = jnp.swapaxes(preds.reshape(B, -1, S), 1, 2)
    g = jnp.swapaxes(targets.reshape(B, -1, S), 1, 2)
    T = p.shape[2]

    # Time tile: multiple of 128 lanes, ~2 MiB of (sublane-padded) VMEM per
    # input buffer so each grid step moves MiB-scale HBM data.
    if tile_t is None:
        tile_t = max(128,
                     ((2 * 1024 * 1024) // (_round_up(S, 8) * 4)) // 128 * 128)
    if T < 128:
        tt = T                                   # single full-extent block
    else:
        tt = max(128, (min(int(tile_t), T) // 128) * 128)

    nk_total = pl.cdiv(T, tt)

    # Optional split of the reduction axis over a second "parallel" grid axis
    # (keeps both v7x TensorCores busy when the batch is 1; harmless on 1-TC
    # chips).  Each split produces a partial [S, S] sum, combined below.
    if time_splits is None:
        time_splits = 2 if B == 1 else 1
    n_split = max(1, min(int(time_splits), nk_total))
    k_per_split = pl.cdiv(nk_total, n_split)

    covered = n_split * k_per_split * tt
    needs_mask = covered != T
    needs_wrap = n_split * k_per_split > nk_total

    def t_block(split, k):
        idx = split * k_per_split + k
        if needs_wrap:
            # Wrap overhanging steps onto a valid tile; the kernel's mask
            # (t0 >= T) zeroes their contribution.  Never indexes OOB blocks.
            idx = idx % nk_total
        return idx

    in_spec = pl.BlockSpec((1, S, tt),
                           lambda b, s, k, t_sm: (b, 0, t_block(s, k)))
    out_spec = pl.BlockSpec((1, 1, S, S),
                            lambda b, s, k, t_sm: (b, s, 0, 0))

    kernel = _make_pairwise_kernel(S, tt, k_per_split, needs_mask,
                                   cross_precision)

    # True flattened length via scalar prefetch (SMEM): the kernel does not
    # bake in T itself, only the (padded) grid shape.
    t_arr = jnp.array([T], dtype=jnp.int32)

    partial = pl.pallas_call(
        kernel,
        out_shape=jax.ShapeDtypeStruct((B, n_split, S, S), jnp.float32),
        grid_spec=pltpu.PrefetchScalarGridSpec(
            num_scalar_prefetch=1,
            grid=(B, n_split, k_per_split),
            in_specs=[in_spec, in_spec],
            out_specs=out_spec,
        ),
        compiler_params=pltpu.CompilerParams(
            dimension_semantics=("parallel", "parallel", "arbitrary"),
            vmem_limit_bytes=32 * 1024 * 1024,
        ),
    )(t_arr, p, g)

    # Tiny: combine per-split partials and fold in the 1/T mean once.
    return jnp.sum(partial, axis=1) * (1.0 / T)


def pit_mse(preds, targets, *, perms_on_host=True, **kw):
    """Permutation Invariant Training loss (PitWrapper with MSE base loss).

    preds, targets: [batch, ..., sources].
    Returns (loss[batch] float32, optimal permutations).  With
    perms_on_host=True (default, matches the PyTorch module) the permutations
    are Python tuples (one small device->host sync); with False they are
    returned as a [batch, sources] int32 device array (no host sync).
    """
    S = preds.shape[-1]
    loss_mat = pairwise_mse_matrix(preds, targets, **kw)            # [B, S, S]

    # S! permutation search (tiny; mirrors _fast_pit incl. first-min ties).
    perms = np.array(list(permutations(range(S))), dtype=np.int32)  # [P, S]
    sel = loss_mat[:, np.arange(S)[None, :], perms]                 # [B, P, S]
    per_perm = jnp.mean(sel, axis=-1)                               # [B, P]
    best = jnp.argmin(per_perm, axis=-1)                            # [B]
    loss = jnp.min(per_perm, axis=-1)                               # [B]

    if not perms_on_host:
        return loss, jnp.take(jnp.asarray(perms), best, axis=0)     # [B, S]

    best_np = np.asarray(jax.device_get(best))
    opt_perms = [tuple(int(x) for x in perms[idx]) for idx in best_np]
    return loss, opt_perms


def _reference_pit_mse(preds, targets):
    """Pure numpy (float64, diff-squared form) reference mirroring PyTorch."""
    B = preds.shape[0]
    S = preds.shape[-1]
    p = np.asarray(jax.device_get(preds)).reshape(B, -1, S).astype(np.float64)
    g = np.asarray(jax.device_get(targets)).reshape(B, -1, S).astype(np.float64)
    lm = np.mean((p[:, :, None, :] - g[:, :, :, None]) ** 2, axis=1)  # [B,S,S]
    losses, opt = [], []
    for b in range(B):
        best_l, best_p = None, None
        for perm in permutations(range(S)):
            c = float(np.mean(lm[b, np.arange(S), np.array(perm)]))
            if best_l is None or best_l > c:
                best_l, best_p = c, perm
        losses.append(best_l)
        opt.append(best_p)
    return np.array(losses, dtype=np.float32), opt


if __name__ == "__main__":
    key = jax.random.PRNGKey(0)
    ks = jax.random.split(key, 6)

    def q(x):
        # Round test inputs to bf16-representable f32 values so the check is
        # insensitive to whichever internal matmul pass-count Mosaic picks.
        return x.astype(jnp.bfloat16).astype(jnp.float32)

    # Case 1: [batch, channels, time, sources] like the speechbrain docstring.
    B, C, T, S = 2, 4, 16, 4
    targets = q(jax.random.uniform(ks[0], (B, C, T, S), jnp.float32))
    true_perm = jnp.array([3, 0, 2, 1])
    preds = q(targets[..., true_perm]
              + 0.05 * jax.random.normal(ks[1], (B, C, T, S), jnp.float32))

    loss, opt_perms = pit_mse(preds, targets)
    loss = jax.block_until_ready(loss)
    ref_loss, ref_perms = _reference_pit_mse(preds, targets)
    assert loss.shape == (B,) and loss.dtype == jnp.float32
    assert np.allclose(np.asarray(loss), ref_loss, atol=2e-5, rtol=1e-4), \
        "case 1: loss mismatch vs reference"
    assert opt_perms == ref_perms, "case 1: permutation mismatch vs reference"

    # Case 2: 3 sources, short ragged time (single full-extent block).
    g2 = q(jax.random.uniform(ks[2], (2, 50, 3), jnp.float32))
    p2 = q(jax.random.uniform(ks[3], (2, 50, 3), jnp.float32))
    loss2, perms2 = pit_mse(p2, g2)
    loss2 = jax.block_until_ready(loss2)
    ref2, refp2 = _reference_pit_mse(p2, g2)
    assert np.allclose(np.asarray(loss2), ref2, atol=2e-5, rtol=1e-4)
    assert perms2 == refp2

    # Case 3: batch=1 (time axis split across two parallel grid steps), small
    # forced tile -> ragged tail tile + wrapped overhang step, all masked.
    g3 = q(jax.random.uniform(ks[4], (1, 513, 3), jnp.float32))
    p3 = q(jax.random.uniform(ks[5], (1, 513, 3), jnp.float32))
    loss3, perms3 = pit_mse(p3, g3, tile_t=128)
    loss3 = jax.block_until_ready(loss3)
    ref3, refp3 = _reference_pit_mse(p3, g3)
    assert np.allclose(np.asarray(loss3), ref3, atol=2e-5, rtol=1e-4)
    assert perms3 == refp3

    print("KERNEL_OK")
</pallas_src>

<mosaic_0001>
module attributes {stable_mosaic.version = 11 : i64} {
  func.func @kernel(%arg0: i32, %arg1: i32, %arg2: i32, %arg3: memref<1xi32, #tpu.memory_space<smem>>, %arg4: memref<1x4x64xf32, #tpu.memory_space<vmem>>, %arg5: memref<1x4x64xf32, #tpu.memory_space<vmem>>, %arg6: memref<1x1x4x4xf32, #tpu.memory_space<vmem>>) attributes {dimension_semantics = [#tpu.dimension_semantics<parallel>, #tpu.dimension_semantics<parallel>, #tpu.dimension_semantics<arbitrary>], iteration_bounds = array<i64: 2, 1, 1>, scalar_prefetch = 1 : i64, scratch_operands = 0 : i64, tpu.core_type = #tpu.core_type<tc>, window_params = [{transform_indices = @transform_0, window_bounds = array<i64: 1, 4, 64>}, {transform_indices = @transform_1, window_bounds = array<i64: 1, 4, 64>}, {transform_indices = @transform_2, window_bounds = array<i64: 1, 1, 4, 4>}]} {
    %c0_i32 = arith.constant 0 : i32
    %0 = arith.cmpi eq, %arg2, %c0_i32 : i32
    %1 = arith.extui %0 : i1 to i32
    %c0_i32_0 = arith.constant 0 : i32
    %2 = arith.cmpi ne, %1, %c0_i32_0 : i32
    scf.if %2 {
      %cst_17 = arith.constant 0.000000e+00 : f32
      %25 = vector.broadcast %cst_17 : f32 to vector<1x1x4x4xf32>
      %c0_18 = arith.constant 0 : index
      %c0_19 = arith.constant 0 : index
      %c0_20 = arith.constant 0 : index
      %c0_21 = arith.constant 0 : index
      %26 = vector.load %arg6[%c0_18, %c0_19, %c0_20, %c0_21] : memref<1x1x4x4xf32, #tpu.memory_space<vmem>>, vector<1x1x4x4xf32>
      tpu.vector_store %arg6[%c0_18, %c0_19, %c0_20, %c0_21], %25 {strides = array<i32>} : memref<1x1x4x4xf32, #tpu.memory_space<vmem>>, vector<1x1x4x4xf32>,
    } else {
    }
    %c0 = arith.constant 0 : index
    %c0_1 = arith.constant 0 : index
    %c0_2 = arith.constant 0 : index
    %3 = vector.load %arg4[%c0, %c0_1, %c0_2] : memref<1x4x64xf32, #tpu.memory_space<vmem>>, vector<1x4x64xf32>
    %4 = vector.shape_cast %3 : vector<1x4x64xf32> to vector<4x64xf32>
    %c0_3 = arith.constant 0 : index
    %c0_4 = arith.constant 0 : index
    %c0_5 = arith.constant 0 : index
    %5 = vector.load %arg5[%c0_3, %c0_4, %c0_5] : memref<1x4x64xf32, #tpu.memory_space<vmem>>, vector<1x4x64xf32>
    %6 = vector.shape_cast %5 : vector<1x4x64xf32> to vector<4x64xf32>
    %cst = arith.constant dense<0.000000e+00> : vector<4x4xf32>
    %7 = tpu.matmul %6, %4, %cst {dimension_numbers = #tpu.dot_dimension_numbers<[1], [1], [0], [0], [0, 0, 1, 0], [], []>} : vector<4x64xf32>, vector<4x64xf32>, vector<4x4xf32> -> vector<4x4xf32>
    %8 = arith.mulf %4, %4 : vector<4x64xf32>
    %cst_6 = arith.constant dense<0.000000e+00> : vector<4xf32>
    %9 = vector.multi_reduction <add>, %8, %cst_6 [1] : vector<4x64xf32> to vector<4xf32>
    %10 = vector.shape_cast %9 : vector<4xf32> to vector<4x1xf32>
    %11 = arith.mulf %6, %6 : vector<4x64xf32>
    %cst_7 = arith.constant dense<0.000000e+00> : vector<4xf32>
    %12 = vector.multi_reduction <add>, %11, %cst_7 [1] : vector<4x64xf32> to vector<4xf32>
    %13 = vector.shape_cast %12 : vector<4xf32> to vector<4x1xf32>
    %14 = tpu.transpose %10, [1, 0] : vector<4x1xf32> -> vector<1x4xf32>
    %15 = vector.broadcast %13 : vector<4x1xf32> to vector<4x4xf32>
    %16 = vector.broadcast %14 : vector<1x4xf32> to vector<4x4xf32>
    %17 = arith.addf %15, %16 : vector<4x4xf32>
    %cst_8 = arith.constant 2.000000e+00 : f32
    %18 = vector.broadcast %cst_8 : f32 to vector<4x4xf32>
    %19 = arith.mulf %18, %7 : vector<4x4xf32>
    %20 = arith.subf %17, %19 : vector<4x4xf32>
    %c0_9 = arith.constant 0 : index
    %c0_10 = arith.constant 0 : index
    %c0_11 = arith.constant 0 : index
    %c0_12 = arith.constant 0 : index
    %21 = vector.load %arg6[%c0_9, %c0_10, %c0_11, %c0_12] : memref<1x1x4x4xf32, #tpu.memory_space<vmem>>, vector<1x1x4x4xf32>
    %22 = vector.shape_cast %20 : vector<4x4xf32> to vector<1x1x4x4xf32>
    %23 = arith.addf %21, %22 : vector<1x1x4x4xf32>
    %c0_13 = arith.constant 0 : index
    %c0_14 = arith.constant 0 : index
    %c0_15 = arith.constant 0 : index
    %c0_16 = arith.constant 0 : index
    %24 = vector.load %arg6[%c0_13, %c0_14, %c0_15, %c0_16] : memref<1x1x4x4xf32, #tpu.memory_space<vmem>>, vector<1x1x4x4xf32>
    tpu.vector_store %arg6[%c0_13, %c0_14, %c0_15, %c0_16], %23 {strides = array<i32>} : memref<1x1x4x4xf32, #tpu.memory_space<vmem>>, vector<1x1x4x4xf32>,
    return
  }
  func.func @transform_0(%arg0: i32, %arg1: i32, %arg2: i32, %arg3: memref<1xi32, #tpu.memory_space<smem>>) -> (i32, i32, i32) {
    %c1_i32 = arith.constant 1 : i32
    %0 = arith.muli %arg1, %c1_i32 : i32
    %1 = arith.addi %0, %arg2 : i32
    %c0_i32 = arith.constant 0 : i32
    %c0_i32_0 = arith.constant 0 : i32
    return %arg0, %c0_i32, %1 : i32, i32, i32
  }
  func.func @transform_1(%arg0: i32, %arg1: i32, %arg2: i32, %arg3: memref<1xi32, #tpu.memory_space<smem>>) -> (i32, i32, i32) {
    %c1_i32 = arith.constant 1 : i32
    %0 = arith.muli %arg1, %c1_i32 : i32
    %1 = arith.addi %0, %arg2 : i32
    %c0_i32 = arith.constant 0 : i32
    %c0_i32_0 = arith.constant 0 : i32
    return %arg0, %c0_i32, %1 : i32, i32, i32
  }
  func.func @transform_2(%arg0: i32, %arg1: i32, %arg2: i32, %arg3: memref<1xi32, #tpu.memory_space<smem>>) -> (i32, i32, i32, i32) {
    %c0_i32 = arith.constant 0 : i32
    %c0_i32_0 = arith.constant 0 : i32
    %c0_i32_1 = arith.constant 0 : i32
    return %arg0, %arg1, %c0_i32, %c0_i32_0 : i32, i32, i32, i32
  }
}

</mosaic_0001>

<bundles_post_ra>
// kernel: tpu_custom_call.1
= control target key start
LH: loop header
LB: loop body
LE: loop exit
PB: predicated region body
PF: predicated region fallthrough
CT: control target
= control target key end

     0   :  { %9 = vsyncpa [#allocation5], 0  ;;  %s989_s0 = inlined_call_operand.<no memory space> [shape: s32[1], index: 0, kind: input, shape index: {}]   ;;  %s990_s1 = inlined_call_operand.hbm [shape: f32[2,4,64], index: 1, kind: input, shape index: {}]   ;;  %s991_s2 = inlined_call_operand.hbm [shape: f32[2,4,64], index: 2, kind: input, shape index: {}]   ;;  %s992_s3 = inlined_call_operand.hbm [shape: f32[2,1,4,4], index: 3, kind: output, shape index: {}]  }
   0x1   :  { %11 = vsyncpa [#allocation5 + $0x1], 0 }
   0x2   :  { %12 = vsyncpa [#allocation8], 0 }
   0x3   :  { %14 = vsyncpa [#allocation8 + $0x1], 0 }
   0x4   :  { %15 = vsyncpa [#allocation6], 0 }
   0x5   :  { %17 = vsyncpa [#allocation6 + $0x1], 0  ;;  %s761_s12 = smov 0   ;;  %s763_s13 = smov 0  }
   0x6   :  { %s765_s0 = smov 0   ;;  %s767_s14 = smov 0  }
   0x7   :  { %s769_s15 = smov 0   ;;  %s771_s16 = smov 0  }
   0x8 LB: > { %s494_s17 = sadd.s32 4294967295, %s734_s16   ;;  %s495_s18 = sadd.s32 4294967294, %s734_s16   ;;  %s734_s16 = sphi %s771_s16, %s23_s16   ;;  %s730_s15 = sphi %s769_s15, %s1012_s15   ;;  %s726_s14 = sphi %s767_s14, %s1011_s14   ;;  %s722_s0 = sphi %s765_s0, %s1010_s0   ;;  %s718_s13 = sphi %s763_s13, %s1009_s13   ;;  %s714_s12 = sphi %s761_s12, %s1008_s12  }
   0x9   : > { %s42_s19 = sadd.s32 1, %s730_s15  ;;  %s53_s20 = sadd.s32 1, %s722_s0 }
   0xa   : > { %p44_p0 = scmp.ge.s32.totalorder %s42_s19, 2  ;;  %p60_p1 = scmp.ne.s32.totalorder %s722_s0, %s718_s13 }
   0xb   : > { %p61_p2 = scmp.eq.s32.totalorder %s734_s16, 0  ;;  %p66_p3 = scmp.ne.s32.totalorder %s718_s13, %s714_s12 }
   0xc   : > { %s1014_s19 = smov (%p44_p0, %s42_s19), 0  ;;  %p67_p5 = scmp.eq.s32.totalorder %s494_s17, 0 }
   0xd   : > { %p802_p4 = por %p61_p2, %p60_p1  ;;  %s48_s22 = ssub.s32 %s730_s15, %s1014_s19 }
   0xe   : > { %p122_p6 = scmp.eq.s32.totalorder %s494_s17, 1  ;;  %p51_p7 = scmp.eq.s32.totalorder %s48_s22, 0 }
   0xf   : > { %p808_p8 = por %p67_p5, %p66_p3  ;;  %p128_p10 = scmp.eq.s32.totalorder %s495_s18, 1 }
  0x10   : > { %p812_p9 = por %p122_p6, %p60_p1  ;;  %p536_p13 = scmp.lt.s32.totalorder %s734_s16, 2 }
  0x11   : > { %s996_s23 = scalar_select %p808_p8, 1, 0 }
  0x12   : > { %s997_s24 = scalar_select %p812_p9, 1, 0 }
  0x13   : > { %s817_s25 = scalar_select %p51_p7, %s722_s0, %s53_s20  }
  0x14   : > { %p819_p11 = por %p128_p10, %p66_p3  ;;  %s826_s27 = sand.u32 1, %s722_s0  }
  0x15   : > { %s498_s28 = sshll.u32 %s826_s27, 2  ;;  %s499_s29 = sshll.u32 %s730_s15, 6 }
  0x16   : > { %s998_s26 = scalar_select %p819_p11, 1, 0 }
  0x17   : > { %s835_s5 = scalar_lea.hbm %s990_s1, %s499_s29  ;;  %s152_s6 = scalar_lea.vmem [#allocation4], %s498_s28 }
  0x18   : > { %s161_s7 = sshll.u32 %s152_s6, 4  ;;  %p843_p0 = pnand %p536_p13, %p802_p4  ;;  %s839_s7 = int_to_ptr.vmem [resolvable:$true] %s161_s7 }
  0x19   : > { %s149_s9 = scalar_lea.sflag [#allocation5], %s826_s27  ;;  %s588_s10 = scalar_lea.hbm %s835_s5, 64 }
  0x1a   : > { %p589_p3 = scmp.ne.s32.totalorder %s835_s5, %s588_s10  ;;  %p590_p5 = pneg %p843_p0 }
  0x1b   : > { %s593_s18 = scalar_lea.hbm %s990_s1, 128  ;;  %p594_p4 = scmp.lt.u32.totalorder %s835_s5, %s990_s1 }
  0x1c   : > { %p591_p6 = pnand %p590_p5, %p589_p3  ;;  %p595_p10 = scmp.lt.u32.totalorder %s593_s18, %s588_s10 }
  0x1d   : > { %p597_p12 = scmp.lt.u32.totalorder %s588_s10, %s835_s5 }
  0x1e   : > { %p592_p7 = pneg %p591_p6  ;;  %p596_p13 = por %p595_p10, %p594_p4 }
  0x20   : > { %p598_p1 = por %p597_p12, %p596_p13 }
  0x22   : > { %p599_p2 = pnand %p598_p1, %p592_p7 }
  0x24   : > { %602 = shalt.err (!%p599_p2)
}
  0x25   : > { %s603_s22 = scalar_lea.vmem %s839_s7, 64  ;;  %s736_s30 = smov [#allocation4]  }
  0x26   : > { %p604_p3 = scmp.ne.s32.totalorder %s839_s7, %s603_s22  ;;  %s608_s4 = sshll.u32 %s736_s30, 4  ;;  %s609_s4 = int_to_ptr.vmem [resolvable:$false] %s608_s4 }
  0x27   : > { %s610_s6 = scalar_lea.vmem %s609_s4, 128  ;;  %p611_p9 = scmp.lt.s32.totalorder %s839_s7, %s609_s4 }
  0x28   : > { %p606_p6 = pnand %p604_p3, %p590_p5  ;;  %p612_p4 = scmp.lt.s32.totalorder %s610_s6, %s603_s22 }
  0x2a   : > { %p607_p11 = pneg %p606_p6  ;;  %p613_p10 = por %p612_p4, %p611_p9 }
  0x2c   : > { %p614_p12 = pnand %p613_p10, %p607_p11 }
  0x2e   : > { %617 = shalt.err (!%p614_p12)
}
  0x2f   : > { %528 = dma.hbm_to_vmem [thread:$0]  (!%p843_p0), %s835_s5, 64, %s839_s7, %s149_s9  }
  0x30   : > { %p1000_p1 = scmp.lt.s32.totalorder %s734_s16, 3  ;;  %p1001_p2 = scmp.ge.s32.totalorder %s734_s16, 1 }
  0x31   : > { %s888_s18 = scalar_lea.hbm %s991_s2, %s499_s29  ;;  %s172_s20 = scalar_lea.vmem [#allocation7], %s498_s28 }
  0x32   : > { %p879_p7 = pnand %p1001_p2, %p1000_p1  ;;  %s181_s21 = sshll.u32 %s172_s20, 4  ;;  %s182_s21 = int_to_ptr.vmem [resolvable:$true] %s181_s21 }
  0x33   : > { %s169_s5 = scalar_lea.sflag [#allocation8], %s826_s27  ;;  %s618_s7 = scalar_lea.hbm %s888_s18, 64 }
  0x34   : > { %s1002_s10 = scalar_select %p879_p7, 1, 0 }
  0x35   : > { %p619_p9 = scmp.ne.s32.totalorder %s888_s18, %s618_s7  ;;  %s623_s29 = scalar_lea.hbm %s991_s2, 128 }
  0x36   : > { %p624_p3 = scmp.lt.u32.totalorder %s888_s18, %s991_s2  ;;  %p625_p6 = scmp.lt.u32.totalorder %s623_s29, %s618_s7 }
  0x37   : > { %p621_p11 = pnand %p619_p9, %p590_p5  ;;  %p627_p10 = scmp.lt.u32.totalorder %s618_s7, %s888_s18 }
  0x38   : > { %p626_p4 = por %p625_p6, %p624_p3 }
  0x39   : > { %p622_p13 = pneg %p621_p11 }
  0x3a   : > { %p628_p12 = por %p627_p10, %p626_p4 }
  0x3c   : > { %p629_p1 = pnand %p628_p12, %p622_p13 }
  0x3e   : > { %632 = shalt.err (!%p629_p1)
}
  0x3f   : > { %s633_s27 = scalar_lea.vmem %s182_s21, 64  ;;  %s737_s28 = smov [#allocation7]  }
  0x40   : > { %p634_p2 = scmp.ne.s32.totalorder %s182_s21, %s633_s27  ;;  %s638_s6 = sshll.u32 %s737_s28, 4  ;;  %s639_s6 = int_to_ptr.vmem [resolvable:$false] %s638_s6 }
  0x41   : > { %s640_s11 = scalar_lea.vmem %s639_s6, 128  ;;  %p641_p8 = scmp.lt.s32.totalorder %s182_s21, %s639_s6 }
  0x42   : > { %p636_p9 = pnand %p634_p2, %p590_p5  ;;  %p642_p7 = scmp.lt.s32.totalorder %s640_s11, %s633_s27 }
  0x44   : > { %p637_p11 = pneg %p636_p9  ;;  %p643_p3 = por %p642_p7, %p641_p8 }
  0x46   : > { %p644_p6 = pnand %p643_p3, %p637_p11 }
  0x48   : > { %647 = shalt.err (!%p644_p6)
}
  0x49   : > { %531 = dma.hbm_to_vmem [thread:$0]  (!%p843_p0), %s888_s18, 64, %s182_s21, %s169_s5  }
  0x4a   : > { %p1003_p13 = scmp.ne.s32.totalorder %s1002_s10, 0 }
  0x4b   : > { %s915_s17 = sand.u32 (!%p1003_p13), 1, %s718_s13   ;;  %p1004_p5 = scmp.ne.s32.totalorder (!%p1003_p13), %s996_s23, 0 }
  0x4c   : > { %190 = sbr.rel (%p1003_p13) target bundleno = 384 (0x180), region = 28  ;;  %s503_s20 = sshll.u32 (!%p1003_p13), %s915_s17, 2 }
  0x4d   : > { %s193_s7 = scalar_lea.sflag (!%p1003_p13), [#allocation5], %s915_s17  ;;  %s196_s9 = scalar_lea.vmem (!%p1003_p13), [#allocation4], %s503_s20 }
  0x53   : > { %701 = dma.done.wait (%p1004_p5), %s193_s7, 64  }
  0x54   : > { %703 = vsyncadd (%p1004_p5), %s193_s7, 4294967232  ;;  %s202_s8 = scalar_lea.sflag [#allocation8], %s915_s17  ;;  %s205_s18 = scalar_lea.vmem [#allocation7], %s503_s20 }
  0x55   : > { %705 = dma.done.wait (%p1004_p5), %s202_s8, 64  }
  0x56   : > { %707 = vsyncadd (%p1004_p5), %s202_s8, 4294967232  ;;  %vm237_vm0 = vcmask 27648   ;;  %s928_s10 = scalar_lea.vmem [#allocation9], %s503_s20  ;;  %v738_v0 = vmov 0.0   ;;  %vm739_vm1 = vmmov 0   ;;  %vm241_vm2 = vcmask 523264  }
  0x57   : > { %238 = vst.msk [vmem:[%s928_s10] sm:$0xf] %vm237_vm0, %v738_v0  ;;  %514 = vmatprep.subr.mxu0 %v738_v0  ;;  %516 = vmatprep.mubr.msk.f32.mxu0 %vm739_vm1, %v738_v0  ;;  %v239_v1 = vld [vmem:[%s196_s9] sm:$0xf]  ;;  %vm319_vm3 = vcmask 519168   ;;  %v359_v10 = vlaneseq  ;;  %s509_s23 = sshll.u32 %s726_s14, 6 }
  0x58   : > { %v240_v2 = vld [vmem:[%s205_s18] sm:$0xf]  ;;  %v318_v3 = vmul.f32 %v239_v1, %v239_v1  ;;  %515 = vmatpush3.xpose.msk.msra.mxu0 %vm241_vm2, %v239_v1  ;;  %s385_s21 = sshll.u32 %s928_s10, 4  ;;  %s938_s29 = scalar_lea.hbm %s992_s3, %s509_s23  ;;  %s940_s21 = int_to_ptr.vmem [resolvable:$true] %s385_s21 }
  0x59   : > { %v323_v4 = vmul.f32 %v240_v2, %v240_v2  ;;  %v360_v11 = vshrl.u32 %v359_v10, 7  ;;  %s371_s30 = scalar_lea.sflag [#allocation6], %s915_s17  ;;  %s648_s4 = scalar_lea.vmem %s940_s21, 64 }
  0x5a   : > { %v320_v5 = vsel %vm319_vm3, %v318_v3, 0.0  ;;  %p649_p8 = scmp.ne.s32.totalorder %s940_s21, %s648_s4  ;;  %p1005_p0 = scmp.ne.s32.totalorder %s997_s24, 0 }
  0x5b   : > { %321 = vadd.xlane.f32.xlu0 %v320_v5  ;;  %517 = vmatmul.mubr.msk.f32.vlgmr.msra.gmra.mrb[0].mxu0 %vm241_vm2, %v240_v2  ;;  %v324_v6 = vsel %vm319_vm3, %v323_v4, 0.0  ;;  %v361_v12 = vsub.s32 0, %v360_v11  ;;  %s740_s14 = smov [#allocation9]  }
  0x5c   : > { %p650_p7 = pnand %p649_p8, %p1005_p0  ;;  %s652_s27 = sshll.u32 %s740_s14, 4  ;;  %s653_s27 = int_to_ptr.vmem [resolvable:$false] %s652_s27 }
  0x5d   : > { %s654_s28 = scalar_lea.vmem %s653_s27, 128  ;;  %p655_p10 = scmp.lt.s32.totalorder %s940_s21, %s653_s27 }
  0x5e   : > { %v366_v18 = vld [vmem:[%s928_s10] sm:$0xf]  ;;  %p651_p4 = pneg %p650_p7  ;;  %p656_p12 = scmp.lt.s32.totalorder %s654_s28, %s648_s4 }
  0x5f   : > { %325 = vadd.xlane.f32.xlu0 %v324_v6 }
  0x60   : > { %p657_p1 = por %p656_p12, %p655_p10 }
  0x62   : > { %p658_p2 = pnand %p657_p1, %p651_p4 }
  0xe8   : > { %v322_v7 = vpop.xlane.xlu0 %321 }
  0xe9   : > { %327 = vxpose.xlu1.b32.start.end [1/1] (short) (narrow) %v322_v7, 8 }
  0xec   : > { %v326_v14 = vpop.xlane.xlu0 %325 }
 0x12e   : > { %v314_v8 = vpop.f32.mrb[0].mxu0 }
 0x12f   : > { %v518_v9 = vpop.f32.mrb[1].mxu0  ;;  %v364_v16 = vmul.f32 2.0, %v314_v8 }
 0x169   : > { %v343_v13 = vpop.trf.xlu1 }
 0x16a   : > { %v362_v15 = vrot.slane %v343_v13, %v361_v12 }
 0x16c   : > { %v363_v17 = vadd.f32 %v362_v15, %v326_v14 }
 0x16e   : > { %v365_v19 = vsub.f32 %v363_v17, %v364_v16 }
 0x170   : > { %v367_v20 = vadd.f32 %v366_v18, %v365_v19 }
 0x172   : > { %369 = vst.msk [vmem:[%s928_s10] sm:$0xf] %vm237_vm0, %v367_v20 }
 0x173   : > { %661 = shalt.err (!%p658_p2)
}
 0x174   : > { %s662_s6 = scalar_lea.hbm %s938_s29, 64  ;;  %s666_s20 = scalar_lea.hbm %s992_s3, 128 }
 0x175   : > { %p663_p9 = scmp.ne.s32.totalorder %s938_s29, %s662_s6  ;;  %p667_p6 = scmp.lt.u32.totalorder %s938_s29, %s992_s3 }
 0x176   : > { %p668_p13 = scmp.lt.u32.totalorder %s666_s20, %s662_s6  ;;  %p670_p8 = scmp.lt.u32.totalorder %s662_s6, %s938_s29 }
 0x177   : > { %p664_p11 = pnand %p663_p9, %p1005_p0 }
 0x178   : > { %p669_p5 = por %p668_p13, %p667_p6 }
 0x179   : > { %p665_p3 = pneg %p664_p11 }
 0x17a   : > { %p671_p7 = por %p670_p8, %p669_p5 }
 0x17c   : > { %p672_p4 = pnand %p671_p7, %p665_p3 }
 0x17e   : > { %675 = shalt.err (!%p672_p4)
}
 0x17f   : > { %523 = dma.vmem_to_hbm [thread:$0]  (%p1005_p0), %s940_s21, 64, %s938_s29, %s371_s30  }
 0x180 PF: > { %s397_s8 = sand.u32 1, %s714_s12   ;;  %p1006_p10 = scmp.ne.s32.totalorder %s998_s26, 0 }
 0x181   : > { %p1007_p12 = scmp.ge.s32.totalorder %s734_s16, 2  ;;  %s398_s18 = scalar_lea.sflag [#allocation6], %s397_s8 }
 0x183   : > { %p533_p1 = pnand %p1007_p12, %p1006_p10 }
 0x185   : > { %709 = dma.done.wait (!%p533_p1), %s398_s18, 64  }
 0x186   : > { %711 = vsyncadd (!%p533_p1), %s398_s18, 4294967232  ;;  %s23_s16 = sadd.s32 1, %s734_s16   ;;  %s1008_s12 = smov %s718_s13 }
 0x187   : > { %p20_p2 = scmp.ge.s32.totalorder %s23_s16, 4   ;;  %s1009_s13 = smov %s722_s0 }
 0x188   : > { %s1010_s0 = smov %s817_s25  ;;  %s1011_s14 = smov %s730_s15 }
 0x189   : > { %s1012_s15 = smov %s1014_s19  ;;  %22 = sbr.rel (!%p20_p2) target bundleno = 8 (0x8), region = 90 }
 0x190   :  { %403 = vsyncpa [#allocation5], 1 }
 0x191   :  { %405 = vsyncpa [#allocation5 + $0x1], 1 }
 0x192   :  { %406 = vsyncpa [#allocation8], 1 }
 0x193   :  { %408 = vsyncpa [#allocation8 + $0x1], 1 }
 0x194   :  { %409 = vsyncpa [#allocation6], 1 }
 0x195   :  { %411 = vsyncpa [#allocation6 + $0x1], 1 }

</bundles_post_ra>
